<compile_context>
chip_gen: v6e
topology: v6e:2x2x1
jax: 0.10.0
libtpu: 0.0.40
codegen_flags: <defaults>
</compile_context>

<pallas_src>
import jax
import jax.numpy as jnp
from jax.experimental import pallas as pl
from jax.experimental.pallas import tpu as pltpu


def se_block_kernel(x_ref, w1t_ref, w2t_ref, o_ref):
    # x_ref block: (Bt, C, HW)
    x = x_ref[...]
    xf = x.astype(jnp.float32)

    # Global average pool over spatial positions -> (Bt, C).
    pooled = jnp.mean(xf, axis=2)

    # FC1 (no bias) + ReLU, batched over the tile: (Bt, C) @ (C, Cr) -> (Bt, Cr).
    h = jnp.dot(pooled, w1t_ref[...], preferred_element_type=jnp.float32)
    h = jnp.maximum(h, 0.0)

    # FC2 (no bias) + Sigmoid: (Bt, Cr) @ (Cr, C) -> (Bt, C).
    s = jnp.dot(h, w2t_ref[...], preferred_element_type=jnp.float32)
    s = jax.nn.sigmoid(s)

    # Broadcast channel gates over spatial positions and rescale input.
    o_ref[...] = x * s.astype(x.dtype)[:, :, None]


def _pick_batch_tile(B, bytes_per_image, target_bytes=2 << 20):
    """Largest divisor of B whose tile is <= target_bytes, keeping >=2 grid steps."""
    bt_cap = max(1, target_bytes // max(bytes_per_image, 1))
    if B >= 2:
        # Keep at least 2 grid steps so both v7x TensorCores get work.
        bt_cap = min(bt_cap, B // 2)
    bt_cap = int(max(1, min(bt_cap, B)))
    for bt in range(bt_cap, 0, -1):
        if B % bt == 0:
            return bt
    return 1


def se_block(x, w1, w2):
    """x: (B, C, H, W), w1: (C//r, C), w2: (C, C//r) (PyTorch Linear layout).

    Returns (B, C, H, W) with the same dtype as x.
    """
    B, C, H, W = x.shape
    HW = H * W
    Cr = w1.shape[0]

    # Lane-dense 2-D view per image: (C, HW). HW should ideally be a multiple
    # of 128 for unmasked vector stores (true for 16x16=256 here).
    # TODO(synk): pad HW to a multiple of 128 (and mask the mean) for odd
    # spatial sizes like 14x14 / 7x7 to avoid masked vst on the output.
    x_flat = x.reshape(B, C, HW)

    # Pre-transpose weights host-side so the kernel's matmuls are
    # (Bt,C)@(C,Cr) and (Bt,Cr)@(Cr,C) with no in-kernel transpose.
    w1_t = jnp.transpose(w1)  # (C, Cr)
    w2_t = jnp.transpose(w2)  # (Cr, C)

    itemsize = jnp.dtype(x.dtype).itemsize
    bytes_per_image = C * HW * itemsize
    Bt = _pick_batch_tile(B, bytes_per_image)
    grid = (B // Bt,)

    # VMEM budget: double-buffered input block + double-buffered output block
    # + resident weights, with ~2x headroom.  Cap at 32 MiB so it always fits
    # within v7x's scoped VMEM (64 MiB physical); v5e/v6e have more.
    block_bytes = Bt * C * HW * itemsize
    weight_bytes = (w1.size + w2.size) * jnp.dtype(w1.dtype).itemsize
    vmem_limit = int(min(max(2 * (4 * block_bytes + weight_bytes), 8 << 20),
                         32 << 20))

    out_flat = pl.pallas_call(
        se_block_kernel,
        out_shape=jax.ShapeDtypeStruct((B, C, HW), x.dtype),
        grid_spec=pltpu.PrefetchScalarGridSpec(
            num_scalar_prefetch=0,
            grid=grid,
            in_specs=[
                pl.BlockSpec((Bt, C, HW), lambda b: (b, 0, 0)),
                # Weights: constant index_map -> DMA'd once, stay resident.
                pl.BlockSpec((C, Cr), lambda b: (0, 0)),
                pl.BlockSpec((Cr, C), lambda b: (0, 0)),
            ],
            out_specs=pl.BlockSpec((Bt, C, HW), lambda b: (b, 0, 0)),
        ),
        compiler_params=pltpu.CompilerParams(
            dimension_semantics=("parallel",),
            vmem_limit_bytes=vmem_limit,
        ),
    )(x_flat, w1_t, w2_t)

    return out_flat.reshape(B, C, H, W)


def se_block_reference(x, w1, w2):
    """Pure-JAX reference mirroring the PyTorch forward pass."""
    y = jnp.mean(x.astype(jnp.float32), axis=(2, 3))      # (B, C) adaptive avg pool
    y = jnp.maximum(y @ w1.T.astype(jnp.float32), 0.0)    # Linear + ReLU
    y = jax.nn.sigmoid(y @ w2.T.astype(jnp.float32))      # Linear + Sigmoid
    return x * y.astype(x.dtype)[:, :, None, None]        # channel-wise scale


if __name__ == "__main__":
    # Module config: channel=8, r=4 -> hidden = channel // r = 2.
    B, C, H, W = 2, 8, 16, 16
    R = 4
    Cr = C // R

    key = jax.random.PRNGKey(0)
    kx, k1, k2 = jax.random.split(key, 3)

    x = jax.random.normal(kx, (B, C, H, W), dtype=jnp.float32)
    # Deterministic "Linear(bias=False)" weights, PyTorch layout (out, in).
    w1 = jax.random.normal(k1, (Cr, C), dtype=jnp.float32) * 0.2
    w2 = jax.random.normal(k2, (C, Cr), dtype=jnp.float32) * 0.2

    out = se_block(x, w1, w2)
    out = jax.block_until_ready(out)

    ref = se_block_reference(x, w1, w2)
    assert out.shape == (B, C, H, W)
    assert jnp.allclose(out, ref, atol=1e-5, rtol=1e-5), "mismatch vs reference"

    print("KERNEL_OK")
</pallas_src>

<mosaic_0001>
module attributes {stable_mosaic.version = 11 : i64} {
  func.func @se_block_kernel(%arg0: i32, %arg1: memref<1x8x256xf32, #tpu.memory_space<vmem>>, %arg2: memref<8x2xf32, #tpu.memory_space<vmem>>, %arg3: memref<2x8xf32, #tpu.memory_space<vmem>>, %arg4: memref<1x8x256xf32, #tpu.memory_space<vmem>>) attributes {dimension_semantics = [#tpu.dimension_semantics<parallel>], iteration_bounds = array<i64: 2>, scalar_prefetch = 0 : i64, scratch_operands = 0 : i64, tpu.core_type = #tpu.core_type<tc>, window_params = [{transform_indices = @transform_0, window_bounds = array<i64: 1, 8, 256>}, {pipeline_mode = #tpu.pipeline_mode<synchronous>, transform_indices = @transform_1, window_bounds = array<i64: 8, 2>}, {pipeline_mode = #tpu.pipeline_mode<synchronous>, transform_indices = @transform_2, window_bounds = array<i64: 2, 8>}, {transform_indices = @transform_3, window_bounds = array<i64: 1, 8, 256>}]} {
    %c0 = arith.constant 0 : index
    %c0_0 = arith.constant 0 : index
    %c0_1 = arith.constant 0 : index
    %0 = vector.load %arg1[%c0, %c0_0, %c0_1] : memref<1x8x256xf32, #tpu.memory_space<vmem>>, vector<1x8x256xf32>
    %cst = arith.constant dense<0.000000e+00> : vector<1x8xf32>
    %1 = vector.multi_reduction <add>, %0, %cst [2] : vector<1x8x256xf32> to vector<1x8xf32>
    %cst_2 = arith.constant 2.560000e+02 : f32
    %2 = vector.broadcast %cst_2 : f32 to vector<1x8xf32>
    %3 = arith.divf %1, %2 : vector<1x8xf32>
    %c0_3 = arith.constant 0 : index
    %c0_4 = arith.constant 0 : index
    %4 = vector.load %arg2[%c0_3, %c0_4] : memref<8x2xf32, #tpu.memory_space<vmem>>, vector<8x2xf32>
    %cst_5 = arith.constant dense<0.000000e+00> : vector<1x2xf32>
    %5 = tpu.matmul %3, %4, %cst_5 {dimension_numbers = #tpu.dot_dimension_numbers<[1], [0], [0], [1], [0, 0, 1, 1], [], []>} : vector<1x8xf32>, vector<8x2xf32>, vector<1x2xf32> -> vector<1x2xf32>
    %cst_6 = arith.constant 0.000000e+00 : f32
    %6 = vector.broadcast %cst_6 : f32 to vector<1x2xf32>
    %7 = arith.maximumf %5, %6 : vector<1x2xf32>
    %c0_7 = arith.constant 0 : index
    %c0_8 = arith.constant 0 : index
    %8 = vector.load %arg3[%c0_7, %c0_8] : memref<2x8xf32, #tpu.memory_space<vmem>>, vector<2x8xf32>
    %cst_9 = arith.constant dense<0.000000e+00> : vector<1x8xf32>
    %9 = tpu.matmul %7, %8, %cst_9 {dimension_numbers = #tpu.dot_dimension_numbers<[1], [0], [0], [1], [0, 0, 1, 1], [], []>} : vector<1x2xf32>, vector<2x8xf32>, vector<1x8xf32> -> vector<1x8xf32>
    %10 = arith.negf %9 : vector<1x8xf32>
    %11 = math.exp %10 : vector<1x8xf32>
    %cst_10 = arith.constant 1.000000e+00 : f32
    %12 = vector.broadcast %cst_10 : f32 to vector<1x8xf32>
    %13 = arith.addf %12, %11 : vector<1x8xf32>
    %14 = arith.divf %12, %13 : vector<1x8xf32>
    %15 = vector.shape_cast %14 : vector<1x8xf32> to vector<1x8x1xf32>
    %16 = vector.broadcast %15 : vector<1x8x1xf32> to vector<1x8x256xf32>
    %17 = arith.mulf %0, %16 : vector<1x8x256xf32>
    %c0_11 = arith.constant 0 : index
    %c0_12 = arith.constant 0 : index
    %c0_13 = arith.constant 0 : index
    %18 = vector.load %arg4[%c0_11, %c0_12, %c0_13] : memref<1x8x256xf32, #tpu.memory_space<vmem>>, vector<1x8x256xf32>
    tpu.vector_store %arg4[%c0_11, %c0_12, %c0_13], %17 {strides = array<i32>} : memref<1x8x256xf32, #tpu.memory_space<vmem>>, vector<1x8x256xf32>,
    return
  }
  func.func @transform_0(%arg0: i32) -> (i32, i32, i32) {
    %c0_i32 = arith.constant 0 : i32
    %c0_i32_0 = arith.constant 0 : i32
    %c0_i32_1 = arith.constant 0 : i32
    return %arg0, %c0_i32, %c0_i32_0 : i32, i32, i32
  }
  func.func @transform_1(%arg0: i32) -> (i32, i32) {
    %c0_i32 = arith.constant 0 : i32
    %c0_i32_0 = arith.constant 0 : i32
    %c0_i32_1 = arith.constant 0 : i32
    return %c0_i32, %c0_i32_0 : i32, i32
  }
  func.func @transform_2(%arg0: i32) -> (i32, i32) {
    %c0_i32 = arith.constant 0 : i32
    %c0_i32_0 = arith.constant 0 : i32
    %c0_i32_1 = arith.constant 0 : i32
    return %c0_i32, %c0_i32_0 : i32, i32
  }
  func.func @transform_3(%arg0: i32) -> (i32, i32, i32) {
    %c0_i32 = arith.constant 0 : i32
    %c0_i32_0 = arith.constant 0 : i32
    %c0_i32_1 = arith.constant 0 : i32
    return %arg0, %c0_i32, %c0_i32_0 : i32, i32, i32
  }
}

</mosaic_0001>

<bundles_post_ra>
// kernel: tpu_custom_call.1
= control target key start
LH: loop header
LB: loop body
LE: loop exit
PB: predicated region body
PF: predicated region fallthrough
CT: control target
= control target key end

     0   :  { %8 = vsyncpa [#allocation3], 0  ;;  %s818_s0 = inlined_call_operand.hbm [shape: f32[2,8,256], index: 0, kind: input, shape index: {}]   ;;  %s819_s1 = inlined_call_operand.vmem [shape: f32[8,2], index: 1, kind: input, shape index: {}]   ;;  %s820_s2 = inlined_call_operand.vmem [shape: f32[2,8], index: 2, kind: input, shape index: {}]   ;;  %s821_s3 = inlined_call_operand.hbm [shape: f32[2,8,256], index: 3, kind: output, shape index: {}]  }
   0x1   :  { %10 = vsyncpa [#allocation3 + $0x1], 0 }
   0x2   :  { %11 = vsyncpa [#allocation4], 0 }
   0x3   :  { %13 = vsyncpa [#allocation4 + $0x1], 0  ;;  %s661_s12 = smov 0   ;;  %s663_s13 = smov 0  }
   0x4   :  { %s665_s14 = smov 0   ;;  %s667_s15 = smov 0  }
   0x5 LB: > { %s682_s16 = sadd.s32 4294967295, %s635_s15   ;;  %s457_s17 = sadd.s32 4294967294, %s635_s15   ;;  %s635_s15 = sphi %s667_s15, %s838_s15   ;;  %s631_s14 = sphi %s665_s14, %s837_s14   ;;  %s627_s13 = sphi %s663_s13, %s836_s13   ;;  %s623_s12 = sphi %s661_s12, %s835_s12  }
   0x6   : > { %s686_s18 = sadd.s32 1, %s635_s15   ;;  %s26_s19 = sadd.s32 1, %s631_s14 }
   0x7   : > { %s23_s20 = ssub.s32 %s635_s15, %s686_s18  ;;  %p33_p0 = scmp.ne.s32.totalorder %s631_s14, %s627_s13 }
   0x8   : > { %p24_p1 = scmp.eq.s32.totalorder %s23_s20, 0  ;;  %p34_p2 = scmp.eq.s32.totalorder %s635_s15, 0 }
   0x9   : > { %p39_p3 = scmp.ne.s32.totalorder %s627_s13, %s623_s12  ;;  %p40_p4 = scmp.eq.s32.totalorder %s682_s16, 0 }
   0xa   : > { %s698_s21 = scalar_select %p24_p1, %s631_s14, %s26_s19  }
   0xb   : > { %p700_p5 = por %p34_p2, %p33_p0  ;;  %p704_p6 = por %p40_p4, %p39_p3 }
   0xc   : > { %p105_p7 = scmp.eq.s32.totalorder %s682_s16, 1  ;;  %p111_p8 = scmp.eq.s32.totalorder %s457_s17, 1 }
   0xd   : > { %s825_s23 = scalar_select %p704_p6, 1, 0 }
   0xe   : > { %p503_p10 = scmp.lt.s32.totalorder %s635_s15, 2  ;;  %p711_p11 = por %p105_p7, %p33_p0 }
   0xf   : > { %p715_p12 = por %p111_p8, %p39_p3  ;;  %s137_s26 = sand.u32 1, %s631_s14  }
  0x10   : > { %s826_s24 = scalar_select %p711_p11, 1, 0 }
  0x11   : > { %s827_s25 = scalar_select %p715_p12, 1, 0 }
  0x12   : > { %s475_s27 = sshll.u32 %s635_s15, 8  ;;  %s460_s28 = sshll.u32 %s137_s26, 4 }
  0x13   : > { %s724_s4 = scalar_lea.hbm %s818_s0, %s475_s27  ;;  %s141_s5 = scalar_lea.vmem [#allocation2], %s460_s28 }
  0x14   : > { %s149_s6 = sshll.u32 %s141_s5, 4  ;;  %p728_p13 = pnand %p503_p10, %p700_p5  ;;  %s732_s6 = int_to_ptr.vmem [resolvable:$true] %s149_s6 }
  0x15   : > { %s138_s8 = scalar_lea.sflag [#allocation3], %s137_s26  ;;  %s543_s9 = scalar_lea.hbm %s724_s4, 256 }
  0x16   : > { %p544_p2 = scmp.ne.s32.totalorder %s724_s4, %s543_s9  ;;  %p545_p3 = pneg %p728_p13 }
  0x17   : > { %s548_s17 = scalar_lea.hbm %s818_s0, 512  ;;  %p549_p5 = scmp.lt.s32.totalorder %s724_s4, %s818_s0 }
  0x18   : > { %p546_p4 = pnand %p545_p3, %p544_p2  ;;  %p550_p8 = scmp.lt.s32.totalorder %s548_s17, %s543_s9 }
  0x1a   : > { %p547_p7 = pneg %p546_p4  ;;  %p551_p10 = por %p550_p8, %p549_p5 }
  0x1c   : > { %p552_p9 = pnand %p551_p10, %p547_p7 }
  0x1e   : > { %555 = shalt.err (!%p552_p9)
}
  0x1f   : > { %s556_s22 = scalar_lea.vmem %s732_s6, 256  ;;  %s637_s26 = smov [#allocation2]  }
  0x20   : > { %p557_p0 = scmp.ne.s32.totalorder %s732_s6, %s556_s22  ;;  %s561_s27 = sshll.u32 %s637_s26, 4  ;;  %s562_s27 = int_to_ptr.vmem [resolvable:$false] %s561_s27 }
  0x21   : > { %s563_s28 = scalar_lea.vmem %s562_s27, 512  ;;  %p564_p4 = scmp.lt.s32.totalorder %s732_s6, %s562_s27 }
  0x22   : > { %p559_p1 = pnand %p557_p0, %p545_p3  ;;  %p565_p12 = scmp.lt.s32.totalorder %s563_s28, %s556_s22 }
  0x24   : > { %p560_p2 = pneg %p559_p1  ;;  %p566_p11 = por %p565_p12, %p564_p4 }
  0x26   : > { %p567_p6 = pnand %p566_p11, %p560_p2 }
  0x28   : > { %570 = shalt.err (!%p567_p6)
}
  0x29   : > { %498 = dma.hbm_to_vmem [thread:$0]  (!%p728_p13), %s724_s4, 256, %s732_s6, %s138_s8  }
  0x2a   : > { %p829_p9 = scmp.lt.s32.totalorder %s635_s15, 3  ;;  %p830_p7 = scmp.ge.s32.totalorder %s635_s15, 1 }
  0x2c   : > { %p155_p0 = pnand %p830_p7, %p829_p9 }
  0x2d   : > { %s759_s29 = sand.u32 (!%p155_p0), 1, %s627_s13   ;;  %p831_p6 = scmp.ne.s32.totalorder (!%p155_p0), %s825_s23, 0 }
  0x2e   : > { %158 = sbr.rel (%p155_p0) target bundleno = 749 (0x2ed), region = 32  ;;  %s464_s30 = sshll.u32 (!%p155_p0), %s759_s29, 4 }
  0x2f   : > { %s161_s5 = scalar_lea.sflag (!%p155_p0), [#allocation3], %s759_s29  ;;  %s164_s7 = scalar_lea.vmem (!%p155_p0), [#allocation2], %s464_s30 }
  0x33   : > { %614 = dma.done.wait (%p831_p6), %s161_s5, 256  }
  0x34   : > { %616 = vsyncadd (%p831_p6), %s161_s5, 4294967040  ;;  %v187_v0 = vld [vmem:[%s164_s7] sm:$0xff]  ;;  %v188_v1 = vld [vmem:[%s164_s7 + $0x8] sm:$0xff]  ;;  %v638_v3 = vmov 0.0   ;;  %vm639_vm0 = vmmov 0   ;;  %v196_v5 = vlaneseq  ;;  %vm202_vm1 = vcmask 64512  }
  0x35   : > { %v189_v2 = vadd.f32 %v188_v1, %v187_v0  ;;  %481 = vmatprep.subr.mxu0 %v638_v3  ;;  %v194_v4 = vld [vmem:[%s819_s1] sm:$0xff]  ;;  %486 = vmatprep.subr.mxu1 %v638_v3  ;;  %vm281_vm2 = vcmask 1041408   ;;  %vm277_vm3 = vcmask 15360   ;;  %s476_s9 = sshll.u32 %s682_s16, 8  ;;  %s186_s10 = scalar_lea.vmem [#allocation5], %s464_s30 }
  0x36   : > { %482 = vmatpush3.msra.mxu0 %v194_v4  ;;  %483 = vmatprep.mubr.msk.f32.mxu0 %vm639_vm0, %v638_v3  ;;  %v197_v6 = vand.u32 127, %v196_v5  ;;  %v199_v7 = vshrl.u32 %v196_v5, 7  ;;  %v276_v12 = vld [vmem:[%s820_s2] sm:$0x3]  ;;  %s387_s11 = sshll.u32 %s186_s10, 4  ;;  %s781_s20 = scalar_lea.hbm %s821_s3, %s476_s9  ;;  %s388_s11 = int_to_ptr.vmem [resolvable:$true] %s387_s11 }
  0x37   : > { %190 = vadd.xlane.f32.xlu0 %v189_v2  ;;  %488 = vmatprep.mubr.msk.f32.mxu1 %vm639_vm0, %v638_v3  ;;  %s373_s22 = scalar_lea.sflag [#allocation4], %s759_s29  ;;  %s571_s26 = scalar_lea.vmem %s388_s11, 256 }
  0x38   : > { %v200_v8 = vsub.s32 %v197_v6, %v199_v7  ;;  %487 = vmatpush3.msk.msra.mxu1 %vm281_vm2, %v276_v12  ;;  %v363_v21 = vsub.s32 0, %v199_v7  ;;  %p572_p11 = scmp.ne.s32.totalorder %s388_s11, %s571_s26  ;;  %p832_p12 = scmp.ne.s32.totalorder %s826_s24, 0 }
  0x39   : > { %s640_s16 = smov [#allocation5]  }
  0x3a   : > { %p573_p13 = pnand %p572_p11, %p832_p12  ;;  %s575_s27 = sshll.u32 %s640_s16, 4  ;;  %s576_s27 = int_to_ptr.vmem [resolvable:$false] %s575_s27 }
  0x3b   : > { %s577_s28 = scalar_lea.vmem %s576_s27, 512  ;;  %p578_p3 = scmp.lt.s32.totalorder %s388_s11, %s576_s27 }
  0x3c   : > { %p574_p1 = pneg %p573_p13  ;;  %p579_p5 = scmp.lt.s32.totalorder %s577_s28, %s571_s26 }
  0x3e   : > { %p580_p8 = por %p579_p5, %p578_p3 }
  0x40   : > { %p581_p10 = pnand %p580_p8, %p574_p1 }
  0xc0   : > { %v191_v9 = vpop.xlane.xlu0 %190 }
  0xc1   : > { %v193_v10 = vmul.f32 0.00390625, %v191_v9 }
  0xc3   : > { %v201_v11 = vrot.slane %v193_v10, %v200_v8 }
  0xc5   : > { %484 = vmatmul.mubr.msk.f32.vlgmr.msra.gmra.mxu0 %vm202_vm1, %v201_v11 }
 0x185   : > { %v271_v13 = vpop.f32.mrf.mxu0 }
 0x186   : > { %v275_v14 = vmax.f32 %v271_v13, 0.0 }
 0x187   : > { %v485_v15 = vpop.f32.mrf.mxu0 }
 0x188   : > { %489 = vmatmul.mubr.msk.f32.vlgmr.msra.gmra.mxu1 %vm277_vm3, %v275_v14 }
 0x248   : > { %v351_v16 = vpop.f32.mrf.mxu1 }
 0x249   : > { %v469_v17 = vmul.f32 -1.442695, %v351_v16 }
 0x24a   : > { %v490_v18 = vpop.f32.mrf.mxu1 }
 0x24b   : > { %539 = vpow2.f32 %v469_v17 }
 0x258   : > { %v540_v19 = vpop.eup %539 }
 0x259   : > { %v358_v20 = vadd.f32 1.0, %v540_v19 }
 0x25b   : > { %541 = vrcp.f32 %v358_v20 }
 0x268   : > { %v542_v22 = vpop.eup %541 }
 0x269   : > { %v364_v23 = vrot.slane %v542_v22, %v363_v21 }
 0x26b   : > { %366 = vbcast.lane.b32.xlu0 %v364_v23, 256 }
 0x2dd   : > { %v367_v24 = vpop.permute.xlu0 %366 }
 0x2de   : > { %v368_v25 = vmul.f32 %v367_v24, %v187_v0  ;;  %v369_v26 = vmul.f32 %v367_v24, %v188_v1 }
 0x2e0   : > { %370 = vst [vmem:[%s186_s10] sm:$0xff] %v368_v25  ;;  %371 = vst [vmem:[%s186_s10 + $0x8] sm:$0xff] %v369_v26 }
 0x2e1   : > { %584 = shalt.err (!%p581_p10)
}
 0x2e2   : > { %s585_s30 = scalar_lea.hbm %s781_s20, 256  ;;  %s589_s7 = scalar_lea.hbm %s821_s3, 512 }
 0x2e3   : > { %p586_p2 = scmp.ne.s32.totalorder %s781_s20, %s585_s30  ;;  %p590_p7 = scmp.lt.s32.totalorder %s781_s20, %s821_s3 }
 0x2e4   : > { %p591_p0 = scmp.lt.s32.totalorder %s589_s7, %s585_s30 }
 0x2e5   : > { %p587_p4 = pnand %p586_p2, %p832_p12 }
 0x2e6   : > { %p592_p6 = por %p591_p0, %p590_p7 }
 0x2e7   : > { %p588_p9 = pneg %p587_p4 }
 0x2e9   : > { %p593_p11 = pnand %p592_p6, %p588_p9 }
 0x2eb   : > { %596 = shalt.err (!%p593_p11)
}
 0x2ec   : > { %493 = dma.vmem_to_hbm [thread:$0]  (%p832_p12), %s388_s11, 256, %s781_s20, %s373_s22  }
 0x2ed PF: > { %s399_s23 = sand.u32 1, %s623_s12   ;;  %p833_p13 = scmp.ne.s32.totalorder %s827_s25, 0 }
 0x2ee   : > { %p834_p1 = scmp.ge.s32.totalorder %s635_s15, 2  ;;  %s400_s8 = scalar_lea.sflag [#allocation4], %s399_s23 }
 0x2f0   : > { %p500_p3 = pnand %p834_p1, %p833_p13 }
 0x2f2   : > { %p501_p5 = pneg %p500_p3 }
 0x2f4   : > { %618 = dma.done.wait (%p501_p5), %s400_s8, 256  }
 0x2f5   : > { %620 = vsyncadd (%p501_p5), %s400_s8, 4294967040  ;;  %p16_p8 = scmp.ge.s32.totalorder %s686_s18, 4   ;;  %s835_s12 = smov %s627_s13 }
 0x2f6   : > { %s836_s13 = smov %s631_s14  ;;  %s837_s14 = smov %s698_s21 }
 0x2f7   : > { %s838_s15 = smov %s686_s18  ;;  %18 = sbr.rel (!%p16_p8) target bundleno = 5 (0x5), region = 77 }
 0x2fc   :  { %405 = vsyncpa [#allocation3], 1 }
 0x2fd   :  { %407 = vsyncpa [#allocation3 + $0x1], 1 }
 0x2fe   :  { %408 = vsyncpa [#allocation4], 1 }
 0x2ff   :  { %410 = vsyncpa [#allocation4 + $0x1], 1 }

</bundles_post_ra>
